<compile_context>
chip_gen: v6e
topology: v6e:2x2x1
jax: 0.10.0
libtpu: 0.0.40
codegen_flags: <defaults>
</compile_context>

<pallas_src>
import jax
import jax.numpy as jnp
from jax import lax
from jax.experimental import pallas as pl
from jax.experimental.pallas import tpu as pltpu


def attention_pallas(x, mask, wqkv, bqkv, wproj, bproj, num_heads):
    B, N, D = x.shape
    H = num_heads
    hd = D // H
    scale = hd ** (-0.5)

    # ---- wrapper-side prep (cheap XLA ops, done once) ----
    # Fold the softmax scale into the Q columns of the fused QKV weight/bias.
    col_scale = jnp.concatenate([jnp.full((D,), scale, jnp.float32),
                                 jnp.ones((2 * D,), jnp.float32)])
    wqkv_b = (wqkv * col_scale[None, :]).astype(jnp.bfloat16)           # (D, 3D)
    bqkv_f = (bqkv * col_scale).reshape(1, 3 * D).astype(jnp.float32)   # (1, 3D)
    wproj_b = wproj.astype(jnp.bfloat16)                                # (D, D)
    bproj_f = bproj.reshape(1, D).astype(jnp.float32)                   # (1, D)

    # Additive mask bias: finite sentinel (robust to fully-masked rows; such a
    # row degrades to a uniform softmax instead of NaN), stored in bf16.
    mask_bias = jnp.where(mask, jnp.float32(-1e30),
                          jnp.float32(0.0)).astype(jnp.bfloat16)        # (B, N, N)

    x_b = x.astype(jnp.bfloat16)

    def kernel(x_ref, bias_ref, wqkv_ref, bqkv_ref, wproj_ref, bproj_ref,
               o_ref, pv_ref):
        x_nd = x_ref[0]                                                 # (N, D) bf16

        # One full-width fused QKV projection; bf16 MXU operands, f32 accum.
        qkv = jnp.dot(x_nd, wqkv_ref[...],
                      preferred_element_type=jnp.float32)               # (N, 3D)
        qkv = qkv + bqkv_ref[...]

        # Cast the additive mask bias to f32 once; reused by every head.
        bias = bias_ref[0].astype(jnp.float32)                          # (N, N)

        # Per-head attention from static lane slices of the QKV slab; each
        # head's P@V lands at its static column offset in the VMEM scratch.
        for h in range(H):
            lo = h * hd
            q_h = qkv[:, lo:lo + hd].astype(jnp.bfloat16)               # (N, hd)
            k_h = qkv[:, D + lo:D + lo + hd].astype(jnp.bfloat16)       # (N, hd)
            v_h = qkv[:, 2 * D + lo:2 * D + lo + hd].astype(jnp.bfloat16)

            s = lax.dot_general(q_h, k_h,
                                dimension_numbers=(((1,), (1,)), ((), ())),
                                preferred_element_type=jnp.float32)     # (N, N)
            s = s + bias

            m = jnp.max(s, axis=-1, keepdims=True)
            e = jnp.exp(s - m)
            p = e * pl.reciprocal(jnp.sum(e, axis=-1, keepdims=True),
                                  approx=True)

            pv_ref[:, lo:lo + hd] = jnp.dot(p.astype(jnp.bfloat16), v_h,
                                            preferred_element_type=jnp.float32)

        # Single full-width output projection over all heads at once.
        pv = pv_ref[...].astype(jnp.bfloat16)                           # (N, D)
        out = jnp.dot(pv, wproj_ref[...],
                      preferred_element_type=jnp.float32) + bproj_ref[...]
        o_ref[0] = out.astype(o_ref.dtype)

    grid_spec = pltpu.PrefetchScalarGridSpec(
        num_scalar_prefetch=0,
        grid=(B,),
        in_specs=[
            pl.BlockSpec((1, N, D), lambda b: (b, 0, 0)),     # x
            pl.BlockSpec((1, N, N), lambda b: (b, 0, 0)),     # mask bias
            pl.BlockSpec((D, 3 * D), lambda b: (0, 0)),       # fused QKV weight (resident)
            pl.BlockSpec((1, 3 * D), lambda b: (0, 0)),       # fused QKV bias  (resident)
            pl.BlockSpec((D, D), lambda b: (0, 0)),           # proj weight     (resident)
            pl.BlockSpec((1, D), lambda b: (0, 0)),           # proj bias       (resident)
        ],
        out_specs=pl.BlockSpec((1, N, D), lambda b: (b, 0, 0)),
        scratch_shapes=[pltpu.VMEM((N, D), jnp.float32)],     # per-head PV staging
    )

    return pl.pallas_call(
        kernel,
        out_shape=jax.ShapeDtypeStruct((B, N, D), jnp.float32),
        grid_spec=grid_spec,
        compiler_params=pltpu.CompilerParams(
            dimension_semantics=("parallel",)),
    )(x_b, mask_bias, wqkv_b, bqkv_f, wproj_b, bproj_f)


def attention_reference(x, mask, wqkv, bqkv, wproj, bproj, num_heads):
    """Pure-JAX f32 reference mirroring the PyTorch forward."""
    B, N, D = x.shape
    hd = D // num_heads
    scale = hd ** (-0.5)
    qkv = x @ wqkv + bqkv                                    # (B, N, 3D)
    qkv = qkv.reshape(B, N, 3, num_heads, hd).transpose(2, 0, 3, 1, 4)
    q, k, v = qkv[0], qkv[1], qkv[2]                         # (B, H, N, hd)
    attn = jnp.einsum("bhqd,bhkd->bhqk", q, k) * scale
    attn = jnp.where(mask[:, None, :, :], -jnp.inf, attn)
    attn = jax.nn.softmax(attn, axis=-1)
    out = jnp.einsum("bhqk,bhkd->bhqd", attn, v)
    out = out.transpose(0, 2, 1, 3).reshape(B, N, D)
    return out @ wproj + bproj


if __name__ == "__main__":
    # Small shapes consistent with the module: B=2, N=8 tokens, dim=32, 8 heads.
    B, N, D, H = 2, 8, 32, 8

    key = jax.random.PRNGKey(0)
    kx, kw1, kb1, kw2, kb2, km = jax.random.split(key, 6)

    x = jax.random.normal(kx, (B, N, D), dtype=jnp.float32)

    lim1 = 1.0 / (D ** 0.5)
    wqkv = jax.random.uniform(kw1, (D, 3 * D), minval=-lim1, maxval=lim1,
                              dtype=jnp.float32)
    bqkv = jax.random.uniform(kb1, (3 * D,), minval=-lim1, maxval=lim1,
                              dtype=jnp.float32)
    wproj = jax.random.uniform(kw2, (D, D), minval=-lim1, maxval=lim1,
                               dtype=jnp.float32)
    bproj = jax.random.uniform(kb2, (D,), minval=-lim1, maxval=lim1,
                               dtype=jnp.float32)

    # Boolean attention mask (True == masked). Keep one unmasked column per
    # row so the f32 reference (which uses -inf) is well defined; the kernel
    # itself is robust to fully-masked rows via the finite -1e30 bias.
    mask = jax.random.bernoulli(km, 0.3, (B, N, N))
    mask = mask.at[:, :, 0].set(False)

    out = attention_pallas(x, mask, wqkv, bqkv, wproj, bproj, H)
    out = jax.block_until_ready(out)

    ref = attention_reference(x, mask, wqkv, bqkv, wproj, bproj, H)
    assert out.shape == (B, N, D)
    # bf16 MXU operands + approx EUP reciprocal -> loosened tolerance vs f32 ref.
    assert jnp.allclose(out, ref, atol=5e-2, rtol=5e-2), "mismatch vs reference"

    print("KERNEL_OK")
</pallas_src>

<mosaic_0001>
module attributes {stable_mosaic.version = 11 : i64} {
  func.func @kernel(%arg0: i32, %arg1: memref<1x8x32xbf16, #tpu.memory_space<vmem>>, %arg2: memref<1x8x8xbf16, #tpu.memory_space<vmem>>, %arg3: memref<32x96xbf16, #tpu.memory_space<vmem>>, %arg4: memref<1x96xf32, #tpu.memory_space<vmem>>, %arg5: memref<32x32xbf16, #tpu.memory_space<vmem>>, %arg6: memref<1x32xf32, #tpu.memory_space<vmem>>, %arg7: memref<1x8x32xf32, #tpu.memory_space<vmem>>, %arg8: memref<8x32xf32, #tpu.memory_space<vmem>>) attributes {dimension_semantics = [#tpu.dimension_semantics<parallel>], iteration_bounds = array<i64: 2>, scalar_prefetch = 0 : i64, scratch_operands = 1 : i64, tpu.core_type = #tpu.core_type<tc>, window_params = [{transform_indices = @transform_0, window_bounds = array<i64: 1, 8, 32>}, {transform_indices = @transform_1, window_bounds = array<i64: 1, 8, 8>}, {pipeline_mode = #tpu.pipeline_mode<synchronous>, transform_indices = @transform_2, window_bounds = array<i64: 32, 96>}, {pipeline_mode = #tpu.pipeline_mode<synchronous>, transform_indices = @transform_3, window_bounds = array<i64: 1, 96>}, {pipeline_mode = #tpu.pipeline_mode<synchronous>, transform_indices = @transform_4, window_bounds = array<i64: 32, 32>}, {pipeline_mode = #tpu.pipeline_mode<synchronous>, transform_indices = @transform_5, window_bounds = array<i64: 1, 32>}, {transform_indices = @transform_6, window_bounds = array<i64: 1, 8, 32>}]} {
    %c0 = arith.constant 0 : index
    %c0_0 = arith.constant 0 : index
    %c0_1 = arith.constant 0 : index
    %0 = vector.load %arg1[%c0, %c0_0, %c0_1] : memref<1x8x32xbf16, #tpu.memory_space<vmem>>, vector<1x8x32xbf16>
    %1 = vector.shape_cast %0 : vector<1x8x32xbf16> to vector<8x32xbf16>
    %c0_2 = arith.constant 0 : index
    %c0_3 = arith.constant 0 : index
    %2 = vector.load %arg3[%c0_2, %c0_3] : memref<32x96xbf16, #tpu.memory_space<vmem>>, vector<32x96xbf16>
    %cst = arith.constant dense<0.000000e+00> : vector<8x96xf32>
    %3 = tpu.matmul %1, %2, %cst {dimension_numbers = #tpu.dot_dimension_numbers<[1], [0], [0], [1], [0, 0, 1, 1], [], []>} : vector<8x32xbf16>, vector<32x96xbf16>, vector<8x96xf32> -> vector<8x96xf32>
    %c0_4 = arith.constant 0 : index
    %c0_5 = arith.constant 0 : index
    %4 = vector.load %arg4[%c0_4, %c0_5] : memref<1x96xf32, #tpu.memory_space<vmem>>, vector<1x96xf32>
    %5 = vector.broadcast %4 : vector<1x96xf32> to vector<8x96xf32>
    %6 = arith.addf %3, %5 : vector<8x96xf32>
    %c0_6 = arith.constant 0 : index
    %c0_7 = arith.constant 0 : index
    %c0_8 = arith.constant 0 : index
    %7 = vector.load %arg2[%c0_6, %c0_7, %c0_8] : memref<1x8x8xbf16, #tpu.memory_space<vmem>>, vector<1x8x8xbf16>
    %8 = vector.shape_cast %7 : vector<1x8x8xbf16> to vector<8x8xbf16>
    %9 = arith.extf %8 : vector<8x8xbf16> to vector<8x8xf32>
    %10 = vector.extract_strided_slice %6 {offsets = [0, 0], sizes = [8, 4], strides = [1, 1]} : vector<8x96xf32> to vector<8x4xf32>
    %11 = arith.truncf %10 : vector<8x4xf32> to vector<8x4xbf16>
    %12 = vector.extract_strided_slice %6 {offsets = [0, 32], sizes = [8, 4], strides = [1, 1]} : vector<8x96xf32> to vector<8x4xf32>
    %13 = arith.truncf %12 : vector<8x4xf32> to vector<8x4xbf16>
    %14 = vector.extract_strided_slice %6 {offsets = [0, 64], sizes = [8, 4], strides = [1, 1]} : vector<8x96xf32> to vector<8x4xf32>
    %15 = arith.truncf %14 : vector<8x4xf32> to vector<8x4xbf16>
    %cst_9 = arith.constant dense<0.000000e+00> : vector<8x8xf32>
    %16 = tpu.matmul %11, %13, %cst_9 {dimension_numbers = #tpu.dot_dimension_numbers<[1], [1], [0], [0], [0, 0, 1, 0], [], []>} : vector<8x4xbf16>, vector<8x4xbf16>, vector<8x8xf32> -> vector<8x8xf32>
    %17 = arith.addf %16, %9 : vector<8x8xf32>
    %cst_10 = arith.constant dense<0xFF800000> : vector<8xf32>
    %18 = vector.multi_reduction <maximumf>, %17, %cst_10 [1] : vector<8x8xf32> to vector<8xf32>
    %19 = vector.shape_cast %18 : vector<8xf32> to vector<8x1xf32>
    %20 = vector.broadcast %19 : vector<8x1xf32> to vector<8x8xf32>
    %21 = arith.subf %17, %20 : vector<8x8xf32>
    %22 = math.exp %21 : vector<8x8xf32>
    %cst_11 = arith.constant dense<0.000000e+00> : vector<8xf32>
    %23 = vector.multi_reduction <add>, %22, %cst_11 [1] : vector<8x8xf32> to vector<8xf32>
    %24 = vector.shape_cast %23 : vector<8xf32> to vector<8x1xf32>
    %25 = tpu.reciprocal %24 {approx = true} : vector<8x1xf32> -> vector<8x1xf32>
    %26 = vector.broadcast %25 : vector<8x1xf32> to vector<8x8xf32>
    %27 = arith.mulf %22, %26 : vector<8x8xf32>
    %28 = arith.truncf %27 : vector<8x8xf32> to vector<8x8xbf16>
    %cst_12 = arith.constant dense<0.000000e+00> : vector<8x4xf32>
    %29 = tpu.matmul %28, %15, %cst_12 {dimension_numbers = #tpu.dot_dimension_numbers<[1], [0], [0], [1], [0, 0, 1, 1], [], []>} : vector<8x8xbf16>, vector<8x4xbf16>, vector<8x4xf32> -> vector<8x4xf32>
    %c0_13 = arith.constant 0 : index
    %c0_14 = arith.constant 0 : index
    %30 = vector.load %arg8[%c0_13, %c0_14] : memref<8x32xf32, #tpu.memory_space<vmem>>, vector<8x4xf32>
    tpu.vector_store %arg8[%c0_13, %c0_14], %29 {strides = array<i32>} : memref<8x32xf32, #tpu.memory_space<vmem>>, vector<8x4xf32>,
    %31 = vector.extract_strided_slice %6 {offsets = [0, 4], sizes = [8, 4], strides = [1, 1]} : vector<8x96xf32> to vector<8x4xf32>
    %32 = arith.truncf %31 : vector<8x4xf32> to vector<8x4xbf16>
    %33 = vector.extract_strided_slice %6 {offsets = [0, 36], sizes = [8, 4], strides = [1, 1]} : vector<8x96xf32> to vector<8x4xf32>
    %34 = arith.truncf %33 : vector<8x4xf32> to vector<8x4xbf16>
    %35 = vector.extract_strided_slice %6 {offsets = [0, 68], sizes = [8, 4], strides = [1, 1]} : vector<8x96xf32> to vector<8x4xf32>
    %36 = arith.truncf %35 : vector<8x4xf32> to vector<8x4xbf16>
    %cst_15 = arith.constant dense<0.000000e+00> : vector<8x8xf32>
    %37 = tpu.matmul %32, %34, %cst_15 {dimension_numbers = #tpu.dot_dimension_numbers<[1], [1], [0], [0], [0, 0, 1, 0], [], []>} : vector<8x4xbf16>, vector<8x4xbf16>, vector<8x8xf32> -> vector<8x8xf32>
    %38 = arith.addf %37, %9 : vector<8x8xf32>
    %cst_16 = arith.constant dense<0xFF800000> : vector<8xf32>
    %39 = vector.multi_reduction <maximumf>, %38, %cst_16 [1] : vector<8x8xf32> to vector<8xf32>
    %40 = vector.shape_cast %39 : vector<8xf32> to vector<8x1xf32>
    %41 = vector.broadcast %40 : vector<8x1xf32> to vector<8x8xf32>
    %42 = arith.subf %38, %41 : vector<8x8xf32>
    %43 = math.exp %42 : vector<8x8xf32>
    %cst_17 = arith.constant dense<0.000000e+00> : vector<8xf32>
    %44 = vector.multi_reduction <add>, %43, %cst_17 [1] : vector<8x8xf32> to vector<8xf32>
    %45 = vector.shape_cast %44 : vector<8xf32> to vector<8x1xf32>
    %46 = tpu.reciprocal %45 {approx = true} : vector<8x1xf32> -> vector<8x1xf32>
    %47 = vector.broadcast %46 : vector<8x1xf32> to vector<8x8xf32>
    %48 = arith.mulf %43, %47 : vector<8x8xf32>
    %49 = arith.truncf %48 : vector<8x8xf32> to vector<8x8xbf16>
    %cst_18 = arith.constant dense<0.000000e+00> : vector<8x4xf32>
    %50 = tpu.matmul %49, %36, %cst_18 {dimension_numbers = #tpu.dot_dimension_numbers<[1], [0], [0], [1], [0, 0, 1, 1], [], []>} : vector<8x8xbf16>, vector<8x4xbf16>, vector<8x4xf32> -> vector<8x4xf32>
    %c0_19 = arith.constant 0 : index
    %c4 = arith.constant 4 : index
    %51 = vector.load %arg8[%c0_19, %c4] : memref<8x32xf32, #tpu.memory_space<vmem>>, vector<8x4xf32>
    tpu.vector_store %arg8[%c0_19, %c4], %50 {strides = array<i32>} : memref<8x32xf32, #tpu.memory_space<vmem>>, vector<8x4xf32>,
    %52 = vector.extract_strided_slice %6 {offsets = [0, 8], sizes = [8, 4], strides = [1, 1]} : vector<8x96xf32> to vector<8x4xf32>
    %53 = arith.truncf %52 : vector<8x4xf32> to vector<8x4xbf16>
    %54 = vector.extract_strided_slice %6 {offsets = [0, 40], sizes = [8, 4], strides = [1, 1]} : vector<8x96xf32> to vector<8x4xf32>
    %55 = arith.truncf %54 : vector<8x4xf32> to vector<8x4xbf16>
    %56 = vector.extract_strided_slice %6 {offsets = [0, 72], sizes = [8, 4], strides = [1, 1]} : vector<8x96xf32> to vector<8x4xf32>
    %57 = arith.truncf %56 : vector<8x4xf32> to vector<8x4xbf16>
    %cst_20 = arith.constant dense<0.000000e+00> : vector<8x8xf32>
    %58 = tpu.matmul %53, %55, %cst_20 {dimension_numbers = #tpu.dot_dimension_numbers<[1], [1], [0], [0], [0, 0, 1, 0], [], []>} : vector<8x4xbf16>, vector<8x4xbf16>, vector<8x8xf32> -> vector<8x8xf32>
    %59 = arith.addf %58, %9 : vector<8x8xf32>
    %cst_21 = arith.constant dense<0xFF800000> : vector<8xf32>
    %60 = vector.multi_reduction <maximumf>, %59, %cst_21 [1] : vector<8x8xf32> to vector<8xf32>
    %61 = vector.shape_cast %60 : vector<8xf32> to vector<8x1xf32>
    %62 = vector.broadcast %61 : vector<8x1xf32> to vector<8x8xf32>
    %63 = arith.subf %59, %62 : vector<8x8xf32>
    %64 = math.exp %63 : vector<8x8xf32>
    %cst_22 = arith.constant dense<0.000000e+00> : vector<8xf32>
    %65 = vector.multi_reduction <add>, %64, %cst_22 [1] : vector<8x8xf32> to vector<8xf32>
    %66 = vector.shape_cast %65 : vector<8xf32> to vector<8x1xf32>
    %67 = tpu.reciprocal %66 {approx = true} : vector<8x1xf32> -> vector<8x1xf32>
    %68 = vector.broadcast %67 : vector<8x1xf32> to vector<8x8xf32>
    %69 = arith.mulf %64, %68 : vector<8x8xf32>
    %70 = arith.truncf %69 : vector<8x8xf32> to vector<8x8xbf16>
    %cst_23 = arith.constant dense<0.000000e+00> : vector<8x4xf32>
    %71 = tpu.matmul %70, %57, %cst_23 {dimension_numbers = #tpu.dot_dimension_numbers<[1], [0], [0], [1], [0, 0, 1, 1], [], []>} : vector<8x8xbf16>, vector<8x4xbf16>, vector<8x4xf32> -> vector<8x4xf32>
    %c0_24 = arith.constant 0 : index
    %c8 = arith.constant 8 : index
    %72 = vector.load %arg8[%c0_24, %c8] : memref<8x32xf32, #tpu.memory_space<vmem>>, vector<8x4xf32>
    tpu.vector_store %arg8[%c0_24, %c8], %71 {strides = array<i32>} : memref<8x32xf32, #tpu.memory_space<vmem>>, vector<8x4xf32>,
    %73 = vector.extract_strided_slice %6 {offsets = [0, 12], sizes = [8, 4], strides = [1, 1]} : vector<8x96xf32> to vector<8x4xf32>
    %74 = arith.truncf %73 : vector<8x4xf32> to vector<8x4xbf16>
    %75 = vector.extract_strided_slice %6 {offsets = [0, 44], sizes = [8, 4], strides = [1, 1]} : vector<8x96xf32> to vector<8x4xf32>
    %76 = arith.truncf %75 : vector<8x4xf32> to vector<8x4xbf16>
    %77 = vector.extract_strided_slice %6 {offsets = [0, 76], sizes = [8, 4], strides = [1, 1]} : vector<8x96xf32> to vector<8x4xf32>
    %78 = arith.truncf %77 : vector<8x4xf32> to vector<8x4xbf16>
    %cst_25 = arith.constant dense<0.000000e+00> : vector<8x8xf32>
    %79 = tpu.matmul %74, %76, %cst_25 {dimension_numbers = #tpu.dot_dimension_numbers<[1], [1], [0], [0], [0, 0, 1, 0], [], []>} : vector<8x4xbf16>, vector<8x4xbf16>, vector<8x8xf32> -> vector<8x8xf32>
    %80 = arith.addf %79, %9 : vector<8x8xf32>
    %cst_26 = arith.constant dense<0xFF800000> : vector<8xf32>
    %81 = vector.multi_reduction <maximumf>, %80, %cst_26 [1] : vector<8x8xf32> to vector<8xf32>
    %82 = vector.shape_cast %81 : vector<8xf32> to vector<8x1xf32>
    %83 = vector.broadcast %82 : vector<8x1xf32> to vector<8x8xf32>
    %84 = arith.subf %80, %83 : vector<8x8xf32>
    %85 = math.exp %84 : vector<8x8xf32>
    %cst_27 = arith.constant dense<0.000000e+00> : vector<8xf32>
    %86 = vector.multi_reduction <add>, %85, %cst_27 [1] : vector<8x8xf32> to vector<8xf32>
    %87 = vector.shape_cast %86 : vector<8xf32> to vector<8x1xf32>
    %88 = tpu.reciprocal %87 {approx = true} : vector<8x1xf32> -> vector<8x1xf32>
    %89 = vector.broadcast %88 : vector<8x1xf32> to vector<8x8xf32>
    %90 = arith.mulf %85, %89 : vector<8x8xf32>
    %91 = arith.truncf %90 : vector<8x8xf32> to vector<8x8xbf16>
    %cst_28 = arith.constant dense<0.000000e+00> : vector<8x4xf32>
    %92 = tpu.matmul %91, %78, %cst_28 {dimension_numbers = #tpu.dot_dimension_numbers<[1], [0], [0], [1], [0, 0, 1, 1], [], []>} : vector<8x8xbf16>, vector<8x4xbf16>, vector<8x4xf32> -> vector<8x4xf32>
    %c0_29 = arith.constant 0 : index
    %c12 = arith.constant 12 : index
    %93 = vector.load %arg8[%c0_29, %c12] : memref<8x32xf32, #tpu.memory_space<vmem>>, vector<8x4xf32>
    tpu.vector_store %arg8[%c0_29, %c12], %92 {strides = array<i32>} : memref<8x32xf32, #tpu.memory_space<vmem>>, vector<8x4xf32>,
    %94 = vector.extract_strided_slice %6 {offsets = [0, 16], sizes = [8, 4], strides = [1, 1]} : vector<8x96xf32> to vector<8x4xf32>
    %95 = arith.truncf %94 : vector<8x4xf32> to vector<8x4xbf16>
    %96 = vector.extract_strided_slice %6 {offsets = [0, 48], sizes = [8, 4], strides = [1, 1]} : vector<8x96xf32> to vector<8x4xf32>
    %97 = arith.truncf %96 : vector<8x4xf32> to vector<8x4xbf16>
    %98 = vector.extract_strided_slice %6 {offsets = [0, 80], sizes = [8, 4], strides = [1, 1]} : vector<8x96xf32> to vector<8x4xf32>
    %99 = arith.truncf %98 : vector<8x4xf32> to vector<8x4xbf16>
    %cst_30 = arith.constant dense<0.000000e+00> : vector<8x8xf32>
    %100 = tpu.matmul %95, %97, %cst_30 {dimension_numbers = #tpu.dot_dimension_numbers<[1], [1], [0], [0], [0, 0, 1, 0], [], []>} : vector<8x4xbf16>, vector<8x4xbf16>, vector<8x8xf32> -> vector<8x8xf32>
    %101 = arith.addf %100, %9 : vector<8x8xf32>
    %cst_31 = arith.constant dense<0xFF800000> : vector<8xf32>
    %102 = vector.multi_reduction <maximumf>, %101, %cst_31 [1] : vector<8x8xf32> to vector<8xf32>
    %103 = vector.shape_cast %102 : vector<8xf32> to vector<8x1xf32>
    %104 = vector.broadcast %103 : vector<8x1xf32> to vector<8x8xf32>
    %105 = arith.subf %101, %104 : vector<8x8xf32>
    %106 = math.exp %105 : vector<8x8xf32>
    %cst_32 = arith.constant dense<0.000000e+00> : vector<8xf32>
    %107 = vector.multi_reduction <add>, %106, %cst_32 [1] : vector<8x8xf32> to vector<8xf32>
    %108 = vector.shape_cast %107 : vector<8xf32> to vector<8x1xf32>
    %109 = tpu.reciprocal %108 {approx = true} : vector<8x1xf32> -> vector<8x1xf32>
    %110 = vector.broadcast %109 : vector<8x1xf32> to vector<8x8xf32>
    %111 = arith.mulf %106, %110 : vector<8x8xf32>
    %112 = arith.truncf %111 : vector<8x8xf32> to vector<8x8xbf16>
    %cst_33 = arith.constant dense<0.000000e+00> : vector<8x4xf32>
    %113 = tpu.matmul %112, %99, %cst_33 {dimension_numbers = #tpu.dot_dimension_numbers<[1], [0], [0], [1], [0, 0, 1, 1], [], []>} : vector<8x8xbf16>, vector<8x4xbf16>, vector<8x4xf32> -> vector<8x4xf32>
    %c0_34 = arith.constant 0 : index
    %c16 = arith.constant 16 : index
    %114 = vector.load %arg8[%c0_34, %c16] : memref<8x32xf32, #tpu.memory_space<vmem>>, vector<8x4xf32>
    tpu.vector_store %arg8[%c0_34, %c16], %113 {strides = array<i32>} : memref<8x32xf32, #tpu.memory_space<vmem>>, vector<8x4xf32>,
    %115 = vector.extract_strided_slice %6 {offsets = [0, 20], sizes = [8, 4], strides = [1, 1]} : vector<8x96xf32> to vector<8x4xf32>
    %116 = arith.truncf %115 : vector<8x4xf32> to vector<8x4xbf16>
    %117 = vector.extract_strided_slice %6 {offsets = [0, 52], sizes = [8, 4], strides = [1, 1]} : vector<8x96xf32> to vector<8x4xf32>
    %118 = arith.truncf %117 : vector<8x4xf32> to vector<8x4xbf16>
    %119 = vector.extract_strided_slice %6 {offsets = [0, 84], sizes = [8, 4], strides = [1, 1]} : vector<8x96xf32> to vector<8x4xf32>
    %120 = arith.truncf %119 : vector<8x4xf32> to vector<8x4xbf16>
    %cst_35 = arith.constant dense<0.000000e+00> : vector<8x8xf32>
    %121 = tpu.matmul %116, %118, %cst_35 {dimension_numbers = #tpu.dot_dimension_numbers<[1], [1], [0], [0], [0, 0, 1, 0], [], []>} : vector<8x4xbf16>, vector<8x4xbf16>, vector<8x8xf32> -> vector<8x8xf32>
    %122 = arith.addf %121, %9 : vector<8x8xf32>
    %cst_36 = arith.constant dense<0xFF800000> : vector<8xf32>
    %123 = vector.multi_reduction <maximumf>, %122, %cst_36 [1] : vector<8x8xf32> to vector<8xf32>
    %124 = vector.shape_cast %123 : vector<8xf32> to vector<8x1xf32>
    %125 = vector.broadcast %124 : vector<8x1xf32> to vector<8x8xf32>
    %126 = arith.subf %122, %125 : vector<8x8xf32>
    %127 = math.exp %126 : vector<8x8xf32>
    %cst_37 = arith.constant dense<0.000000e+00> : vector<8xf32>
    %128 = vector.multi_reduction <add>, %127, %cst_37 [1] : vector<8x8xf32> to vector<8xf32>
    %129 = vector.shape_cast %128 : vector<8xf32> to vector<8x1xf32>
    %130 = tpu.reciprocal %129 {approx = true} : vector<8x1xf32> -> vector<8x1xf32>
    %131 = vector.broadcast %130 : vector<8x1xf32> to vector<8x8xf32>
    %132 = arith.mulf %127, %131 : vector<8x8xf32>
    %133 = arith.truncf %132 : vector<8x8xf32> to vector<8x8xbf16>
    %cst_38 = arith.constant dense<0.000000e+00> : vector<8x4xf32>
    %134 = tpu.matmul %133, %120, %cst_38 {dimension_numbers = #tpu.dot_dimension_numbers<[1], [0], [0], [1], [0, 0, 1, 1], [], []>} : vector<8x8xbf16>, vector<8x4xbf16>, vector<8x4xf32> -> vector<8x4xf32>
    %c0_39 = arith.constant 0 : index
    %c20 = arith.constant 20 : index
    %135 = vector.load %arg8[%c0_39, %c20] : memref<8x32xf32, #tpu.memory_space<vmem>>, vector<8x4xf32>
    tpu.vector_store %arg8[%c0_39, %c20], %134 {strides = array<i32>} : memref<8x32xf32, #tpu.memory_space<vmem>>, vector<8x4xf32>,
    %136 = vector.extract_strided_slice %6 {offsets = [0, 24], sizes = [8, 4], strides = [1, 1]} : vector<8x96xf32> to vector<8x4xf32>
    %137 = arith.truncf %136 : vector<8x4xf32> to vector<8x4xbf16>
    %138 = vector.extract_strided_slice %6 {offsets = [0, 56], sizes = [8, 4], strides = [1, 1]} : vector<8x96xf32> to vector<8x4xf32>
    %139 = arith.truncf %138 : vector<8x4xf32> to vector<8x4xbf16>
    %140 = vector.extract_strided_slice %6 {offsets = [0, 88], sizes = [8, 4], strides = [1, 1]} : vector<8x96xf32> to vector<8x4xf32>
    %141 = arith.truncf %140 : vector<8x4xf32> to vector<8x4xbf16>
    %cst_40 = arith.constant dense<0.000000e+00> : vector<8x8xf32>
    %142 = tpu.matmul %137, %139, %cst_40 {dimension_numbers = #tpu.dot_dimension_numbers<[1], [1], [0], [0], [0, 0, 1, 0], [], []>} : vector<8x4xbf16>, vector<8x4xbf16>, vector<8x8xf32> -> vector<8x8xf32>
    %143 = arith.addf %142, %9 : vector<8x8xf32>
    %cst_41 = arith.constant dense<0xFF800000> : vector<8xf32>
    %144 = vector.multi_reduction <maximumf>, %143, %cst_41 [1] : vector<8x8xf32> to vector<8xf32>
    %145 = vector.shape_cast %144 : vector<8xf32> to vector<8x1xf32>
    %146 = vector.broadcast %145 : vector<8x1xf32> to vector<8x8xf32>
    %147 = arith.subf %143, %146 : vector<8x8xf32>
    %148 = math.exp %147 : vector<8x8xf32>
    %cst_42 = arith.constant dense<0.000000e+00> : vector<8xf32>
    %149 = vector.multi_reduction <add>, %148, %cst_42 [1] : vector<8x8xf32> to vector<8xf32>
    %150 = vector.shape_cast %149 : vector<8xf32> to vector<8x1xf32>
    %151 = tpu.reciprocal %150 {approx = true} : vector<8x1xf32> -> vector<8x1xf32>
    %152 = vector.broadcast %151 : vector<8x1xf32> to vector<8x8xf32>
    %153 = arith.mulf %148, %152 : vector<8x8xf32>
    %154 = arith.truncf %153 : vector<8x8xf32> to vector<8x8xbf16>
    %cst_43 = arith.constant dense<0.000000e+00> : vector<8x4xf32>
    %155 = tpu.matmul %154, %141, %cst_43 {dimension_numbers = #tpu.dot_dimension_numbers<[1], [0], [0], [1], [0, 0, 1, 1], [], []>} : vector<8x8xbf16>, vector<8x4xbf16>, vector<8x4xf32> -> vector<8x4xf32>
    %c0_44 = arith.constant 0 : index
    %c24 = arith.constant 24 : index
    %156 = vector.load %arg8[%c0_44, %c24] : memref<8x32xf32, #tpu.memory_space<vmem>>, vector<8x4xf32>
    tpu.vector_store %arg8[%c0_44, %c24], %155 {strides = array<i32>} : memref<8x32xf32, #tpu.memory_space<vmem>>, vector<8x4xf32>,
    %157 = vector.extract_strided_slice %6 {offsets = [0, 28], sizes = [8, 4], strides = [1, 1]} : vector<8x96xf32> to vector<8x4xf32>
    %158 = arith.truncf %157 : vector<8x4xf32> to vector<8x4xbf16>
    %159 = vector.extract_strided_slice %6 {offsets = [0, 60], sizes = [8, 4], strides = [1, 1]} : vector<8x96xf32> to vector<8x4xf32>
    %160 = arith.truncf %159 : vector<8x4xf32> to vector<8x4xbf16>
    %161 = vector.extract_strided_slice %6 {offsets = [0, 92], sizes = [8, 4], strides = [1, 1]} : vector<8x96xf32> to vector<8x4xf32>
    %162 = arith.truncf %161 : vector<8x4xf32> to vector<8x4xbf16>
    %cst_45 = arith.constant dense<0.000000e+00> : vector<8x8xf32>
    %163 = tpu.matmul %158, %160, %cst_45 {dimension_numbers = #tpu.dot_dimension_numbers<[1], [1], [0], [0], [0, 0, 1, 0], [], []>} : vector<8x4xbf16>, vector<8x4xbf16>, vector<8x8xf32> -> vector<8x8xf32>
    %164 = arith.addf %163, %9 : vector<8x8xf32>
    %cst_46 = arith.constant dense<0xFF800000> : vector<8xf32>
    %165 = vector.multi_reduction <maximumf>, %164, %cst_46 [1] : vector<8x8xf32> to vector<8xf32>
    %166 = vector.shape_cast %165 : vector<8xf32> to vector<8x1xf32>
    %167 = vector.broadcast %166 : vector<8x1xf32> to vector<8x8xf32>
    %168 = arith.subf %164, %167 : vector<8x8xf32>
    %169 = math.exp %168 : vector<8x8xf32>
    %cst_47 = arith.constant dense<0.000000e+00> : vector<8xf32>
    %170 = vector.multi_reduction <add>, %169, %cst_47 [1] : vector<8x8xf32> to vector<8xf32>
    %171 = vector.shape_cast %170 : vector<8xf32> to vector<8x1xf32>
    %172 = tpu.reciprocal %171 {approx = true} : vector<8x1xf32> -> vector<8x1xf32>
    %173 = vector.broadcast %172 : vector<8x1xf32> to vector<8x8xf32>
    %174 = arith.mulf %169, %173 : vector<8x8xf32>
    %175 = arith.truncf %174 : vector<8x8xf32> to vector<8x8xbf16>
    %cst_48 = arith.constant dense<0.000000e+00> : vector<8x4xf32>
    %176 = tpu.matmul %175, %162, %cst_48 {dimension_numbers = #tpu.dot_dimension_numbers<[1], [0], [0], [1], [0, 0, 1, 1], [], []>} : vector<8x8xbf16>, vector<8x4xbf16>, vector<8x4xf32> -> vector<8x4xf32>
    %c0_49 = arith.constant 0 : index
    %c28 = arith.constant 28 : index
    %177 = vector.load %arg8[%c0_49, %c28] : memref<8x32xf32, #tpu.memory_space<vmem>>, vector<8x4xf32>
    tpu.vector_store %arg8[%c0_49, %c28], %176 {strides = array<i32>} : memref<8x32xf32, #tpu.memory_space<vmem>>, vector<8x4xf32>,
    %c0_50 = arith.constant 0 : index
    %c0_51 = arith.constant 0 : index
    %178 = vector.load %arg8[%c0_50, %c0_51] : memref<8x32xf32, #tpu.memory_space<vmem>>, vector<8x32xf32>
    %179 = arith.truncf %178 : vector<8x32xf32> to vector<8x32xbf16>
    %c0_52 = arith.constant 0 : index
    %c0_53 = arith.constant 0 : index
    %180 = vector.load %arg5[%c0_52, %c0_53] : memref<32x32xbf16, #tpu.memory_space<vmem>>, vector<32x32xbf16>
    %cst_54 = arith.constant dense<0.000000e+00> : vector<8x32xf32>
    %181 = tpu.matmul %179, %180, %cst_54 {dimension_numbers = #tpu.dot_dimension_numbers<[1], [0], [0], [1], [0, 0, 1, 1], [], []>} : vector<8x32xbf16>, vector<32x32xbf16>, vector<8x32xf32> -> vector<8x32xf32>
    %c0_55 = arith.constant 0 : index
    %c0_56 = arith.constant 0 : index
    %182 = vector.load %arg6[%c0_55, %c0_56] : memref<1x32xf32, #tpu.memory_space<vmem>>, vector<1x32xf32>
    %183 = vector.broadcast %182 : vector<1x32xf32> to vector<8x32xf32>
    %184 = arith.addf %181, %183 : vector<8x32xf32>
    %c0_57 = arith.constant 0 : index
    %c0_58 = arith.constant 0 : index
    %c0_59 = arith.constant 0 : index
    %185 = vector.load %arg7[%c0_57, %c0_58, %c0_59] : memref<1x8x32xf32, #tpu.memory_space<vmem>>, vector<1x8x32xf32>
    %186 = vector.shape_cast %185 : vector<1x8x32xf32> to vector<8x32xf32>
    %187 = vector.shape_cast %184 : vector<8x32xf32> to vector<1x8x32xf32>
    tpu.vector_store %arg7[%c0_57, %c0_58, %c0_59], %187 {strides = array<i32>} : memref<1x8x32xf32, #tpu.memory_space<vmem>>, vector<1x8x32xf32>,
    return
  }
  func.func @transform_0(%arg0: i32) -> (i32, i32, i32) {
    %c0_i32 = arith.constant 0 : i32
    %c0_i32_0 = arith.constant 0 : i32
    %c0_i32_1 = arith.constant 0 : i32
    return %arg0, %c0_i32, %c0_i32_0 : i32, i32, i32
  }
  func.func @transform_1(%arg0: i32) -> (i32, i32, i32) {
    %c0_i32 = arith.constant 0 : i32
    %c0_i32_0 = arith.constant 0 : i32
    %c0_i32_1 = arith.constant 0 : i32
    return %arg0, %c0_i32, %c0_i32_0 : i32, i32, i32
  }
  func.func @transform_2(%arg0: i32) -> (i32, i32) {
    %c0_i32 = arith.constant 0 : i32
    %c0_i32_0 = arith.constant 0 : i32
    %c0_i32_1 = arith.constant 0 : i32
    return %c0_i32, %c0_i32_0 : i32, i32
  }
  func.func @transform_3(%arg0: i32) -> (i32, i32) {
    %c0_i32 = arith.constant 0 : i32
    %c0_i32_0 = arith.constant 0 : i32
    %c0_i32_1 = arith.constant 0 : i32
    return %c0_i32, %c0_i32_0 : i32, i32
  }
  func.func @transform_4(%arg0: i32) -> (i32, i32) {
    %c0_i32 = arith.constant 0 : i32
    %c0_i32_0 = arith.constant 0 : i32
    %c0_i32_1 = arith.constant 0 : i32
    return %c0_i32, %c0_i32_0 : i32, i32
  }
  func.func @transform_5(%arg0: i32) -> (i32, i32) {
    %c0_i32 = arith.constant 0 : i32
    %c0_i32_0 = arith.constant 0 : i32
    %c0_i32_1 = arith.constant 0 : i32
    return %c0_i32, %c0_i32_0 : i32, i32
  }
  func.func @transform_6(%arg0: i32) -> (i32, i32, i32) {
    %c0_i32 = arith.constant 0 : i32
    %c0_i32_0 = arith.constant 0 : i32
    %c0_i32_1 = arith.constant 0 : i32
    return %arg0, %c0_i32, %c0_i32_0 : i32, i32, i32
  }
}

</mosaic_0001>

<bundles_post_ra>
// kernel: tpu_custom_call.1
= control target key start
LH: loop header
LB: loop body
LE: loop exit
PB: predicated region body
PF: predicated region fallthrough
CT: control target
= control target key end

     0   :  { %s2536_s0 = inlined_call_operand.hbm [shape: bf16[2,8,32], index: 0, kind: input, shape index: {}]   ;;  %s2537_s1 = inlined_call_operand.hbm [shape: bf16[2,8,8], index: 1, kind: input, shape index: {}]   ;;  %s2538_s2 = inlined_call_operand.hbm [shape: bf16[32,96], index: 2, kind: input, shape index: {}]   ;;  %s2539_s3 = inlined_call_operand.vmem [shape: f32[1,96], index: 3, kind: input, shape index: {}]   ;;  %s2540_s4 = inlined_call_operand.hbm [shape: bf16[32,32], index: 4, kind: input, shape index: {}]   ;;  %s2541_s5 = inlined_call_operand.vmem [shape: f32[1,32], index: 5, kind: input, shape index: {}]   ;;  %s2542_s6 = inlined_call_operand.hbm [shape: f32[2,8,32], index: 6, kind: output, shape index: {}]  }
   0x1   :  { %2547 = sst [smem:[#allocation18_spill]] %s2538_s2 }
   0x2   :  { %2548 = sst [smem:[#allocation19_spill]] %s2540_s4 }
   0x3   :  { %11 = vsyncpa [#allocation4], 0 }
   0x4   :  { %13 = vsyncpa [#allocation4 + $0x1], 0 }
   0x5   :  { %14 = vsyncpa [#allocation7], 0 }
   0x6   :  { %16 = vsyncpa [#allocation7 + $0x1], 0 }
   0x7   :  { %17 = vsyncpa [#allocation10], 0 }
   0x8   :  { %18 = vsyncpa [#allocation5], 0 }
   0x9   :  { %20 = vsyncpa [#allocation5 + $0x1], 0  ;;  %s2120_s21 = smov 0   ;;  %s2122_s22 = smov 0  }
   0xa   :  { %s2124_s23 = smov 0   ;;  %s2126_s24 = smov 0  }
   0xb LB: > { %s2141_s25 = sadd.s32 4294967295, %s2044_s24   ;;  %s1525_s26 = sadd.s32 4294967294, %s2044_s24   ;;  %s2044_s24 = sphi %s2126_s24, %s2572_s24   ;;  %s2040_s23 = sphi %s2124_s23, %s2571_s23   ;;  %s2036_s22 = sphi %s2122_s22, %s2570_s22   ;;  %s2032_s21 = sphi %s2120_s21, %s2569_s21  }
   0xc   : > { %p46_p0 = scmp.ne.s32.totalorder %s2036_s22, %s2032_s21  ;;  %p2543_p1 = scmp.eq.s32.totalorder %s2141_s25, 0 }
   0xd   : > { %p186_p3 = scmp.eq.s32.totalorder %s1525_s26, 1  ;;  %p1526_p5 = scmp.ge.s32.totalorder %s2044_s24, 1 }
   0xe   : > { %p2150_p4 = por %p2543_p1, %p46_p0  ;;  %p193_p7 = scmp.lt.s32.totalorder %s2044_s24, 3 }
   0xf   : > { %p2155_p6 = por %p186_p3, %p46_p0  ;;  %s2046_s30 = smov [#allocation8]  }
  0x10   : > { %s2549_s27 = scalar_select %p2150_p4, 1, 0 }
  0x11   : > { %s2550_s28 = scalar_select %p2155_p6, 1, 0 }
  0x12   : > { %p2160_p8 = pnand %p1526_p5, %p193_p7  ;;  %s205_s7 = sshll.u32 %s2046_s30, 4  ;;  %s206_s7 = int_to_ptr.vmem [resolvable:$true] %s205_s7 }
  0x13   : > { %s2047_s9 = smov [#allocation9]   ;;  %s1871_s11 = scalar_lea.vmem %s206_s7, 256 }
  0x14   : > { %s2551_s29 = scalar_select %p2160_p8, 1, 0 }
  0x15   : > { %p1732_p9 = pneg %p2160_p8  ;;  %s221_s10 = sshll.u32 %s2047_s9, 4  ;;  %s222_s10 = int_to_ptr.vmem [resolvable:$true] %s221_s10 }
  0x16   : > { %p1872_p13 = scmp.ne.s32.totalorder %s206_s7, %s1871_s11  ;;  %p1879_p5 = scmp.lt.s32.totalorder %s206_s7, %s206_s7 }
  0x17   : > { %p2169_p11 = pnand %p1732_p9, %p2543_p1  ;;  %p1880_p7 = scmp.lt.s32.totalorder %s1871_s11, %s1871_s11 }
  0x19   : > { %p1862_p12 = pneg %p2169_p11  ;;  %p1881_p10 = por %p1880_p7, %p1879_p5 }
  0x1b   : > { %p1874_p0 = pnand %p1872_p13, %p1862_p12 }
  0x1d   : > { %p1875_p3 = pneg %p1874_p0 }
  0x1f   : > { %p1882_p9 = pnand %p1881_p10, %p1875_p3 }
  0x21   : > { %1885 = shalt.err (!%p1882_p9)
}
  0x22   : > { %s2048_s12 = smov 64   ;;  %s2049_s13 = smov 4  }
  0x23   : > { %s2553_s2 = sld [smem:[#allocation18_spill]]  ;;  %s1897_s16 = scalar_lea.vmem %s222_s10, 256 }
  0x24   : > { %p1898_p1 = scmp.ne.s32.totalorder %s222_s10, %s1897_s16  ;;  %p1905_p2 = scmp.lt.s32.totalorder %s222_s10, %s222_s10 }
  0x25   : > { %p1906_p6 = scmp.lt.s32.totalorder %s1897_s16, %s1897_s16 }
  0x26   : > { %p1900_p13 = pnand %p1898_p1, %p1862_p12 }
  0x27   : > { %p1907_p5 = por %p1906_p6, %p1905_p2 }
  0x28   : > { %p1901_p0 = pneg %p1900_p13 }
  0x29   : > { %1735 = dma.hbm_to_vmem [thread:$0]  (!%p2169_p11), %s2553_s2, 256, %s206_s7, [#allocation7], %s2048_s12, %s2048_s12, %s2049_s13  }
  0x2a   : > { %p1908_p10 = pnand %p1907_p5, %p1901_p0 }
  0x2c   : > { %1911 = shalt.err (!%p1908_p10)
}
  0x2d   : > { %s2554_s4 = sld [smem:[#allocation19_spill]]  ;;  %s2192_s19 = sadd.s32 1, %s2044_s24  }
  0x2e   : > { %s33_s20 = sadd.s32 1, %s2040_s23  ;;  %s30_s26 = ssub.s32 %s2044_s24, %s2192_s19 }
  0x2f   : > { %p40_p1 = scmp.ne.s32.totalorder %s2040_s23, %s2036_s22  ;;  %p31_p2 = scmp.eq.s32.totalorder %s30_s26, 0 }
  0x30   : > { %p41_p6 = scmp.eq.s32.totalorder %s2044_s24, 0  ;;  %p2555_p12 = scmp.eq.s32.totalorder %s2141_s25, 1 }
  0x31   : > { %p1752_p7 = scmp.lt.s32.totalorder %s2044_s24, 2  ;;  %s238_s8 = sand.u32 1, %s2040_s23  }
  0x32   : > { %p2202_p3 = por %p2555_p12, %p40_p1  ;;  %p42_p9 = por %p41_p6, %p40_p1 }
  0x33   : > { %1738 = dma.hbm_to_vmem [thread:$0]  (!%p2169_p11), %s2554_s4, 256, %s222_s10, [#allocation10], %s2048_s12, %s2048_s12, %s2049_s13  }
  0x34   : > { %s2556_s30 = scalar_select %p2202_p3, 1, 0 }
  0x35   : > { %s2208_s7 = scalar_select %p31_p2, %s2040_s23, %s33_s20  }
  0x36   : > { %s2211_s9 = sshll.u32 %s238_s8, 2  ;;  %s1531_s10 = sshll.u32 %s2044_s24, 6 }
  0x37   : > { %2557 = sst [smem:[#allocation17_spill]] %s2208_s7  ;;  %s2217_s13 = scalar_lea.hbm %s2536_s0, %s1531_s10 }
  0x38   : > { %s242_s14 = scalar_lea.vmem [#allocation3], %s2211_s9  ;;  %p2222_p11 = pnand %p1752_p7, %p42_p9 }
  0x39   : > { %s249_s15 = sshll.u32 %s242_s14, 4  ;;  %s2229_s20 = scalar_lea.hbm %s2537_s1, %s1531_s10  ;;  %s2220_s15 = int_to_ptr.vmem [resolvable:$true] %s249_s15 }
  0x3a   : > { %s256_s26 = sand.u32 1, %s2044_s24   ;;  %s239_s11 = scalar_lea.sflag [#allocation4], %s238_s8 }
  0x3b   : > { %s1912_s12 = scalar_lea.hbm %s2217_s13, 64  ;;  %p1914_p0 = pneg %p2222_p11 }
  0x3c   : > { %p1913_p13 = scmp.ne.s32.totalorder %s2217_s13, %s1912_s12  ;;  %s1917_s4 = scalar_lea.hbm %s2536_s0, 128 }
  0x3d   : > { %p1918_p1 = scmp.lt.s32.totalorder %s2217_s13, %s2536_s0  ;;  %p1919_p2 = scmp.lt.s32.totalorder %s1917_s4, %s1912_s12 }
  0x3e   : > { %p1915_p5 = pnand %p1914_p0, %p1913_p13 }
  0x3f   : > { %p1920_p6 = por %p1919_p2, %p1918_p1 }
  0x40   : > { %p1916_p10 = pneg %p1915_p5 }
  0x42   : > { %p1921_p12 = pnand %p1920_p6, %p1916_p10 }
  0x44   : > { %1924 = shalt.err (!%p1921_p12)
}
  0x45   : > { %s1925_s8 = scalar_lea.vmem %s2220_s15, 64  ;;  %s2050_s2 = smov [#allocation3]  }
  0x46   : > { %p1926_p7 = scmp.ne.s32.totalorder %s2220_s15, %s1925_s8  ;;  %s1930_s10 = sshll.u32 %s2050_s2, 4  ;;  %s1931_s10 = int_to_ptr.vmem [resolvable:$false] %s1930_s10 }
  0x47   : > { %s1932_s18 = scalar_lea.vmem %s1931_s10, 128  ;;  %p1933_p5 = scmp.lt.s32.totalorder %s2220_s15, %s1931_s10 }
  0x48   : > { %p1928_p9 = pnand %p1926_p7, %p1914_p0  ;;  %p1934_p3 = scmp.lt.s32.totalorder %s1932_s18, %s1925_s8 }
  0x4a   : > { %p1929_p13 = pneg %p1928_p9  ;;  %p1935_p4 = por %p1934_p3, %p1933_p5 }
  0x4c   : > { %p1936_p1 = pnand %p1935_p4, %p1929_p13 }
  0x4e   : > { %1939 = shalt.err (!%p1936_p1)
}
  0x4f   : > { %1742 = dma.hbm_to_vmem [thread:$0]  (!%p2222_p11), %s2217_s13, 64, %s2220_s15, %s239_s11  }
  0x50   : > { %s260_s4 = scalar_lea.vmem [#allocation6], %s2211_s9  ;;  %s257_s12 = scalar_lea.sflag [#allocation7], %s256_s26 }
  0x51   : > { %s267_s7 = sshll.u32 %s260_s4, 4  ;;  %s1940_s14 = scalar_lea.hbm %s2229_s20, 64  ;;  %s268_s7 = int_to_ptr.vmem [resolvable:$true] %s267_s7 }
  0x52   : > { %p1941_p3 = scmp.ne.s32.totalorder %s2229_s20, %s1940_s14  ;;  %s1945_s2 = scalar_lea.hbm %s2537_s1, 128 }
  0x53   : > { %p1946_p2 = scmp.lt.s32.totalorder %s2229_s20, %s2537_s1  ;;  %p1947_p6 = scmp.lt.s32.totalorder %s1945_s2, %s1940_s14 }
  0x54   : > { %p1943_p4 = pnand %p1941_p3, %p1914_p0 }
  0x55   : > { %p1948_p12 = por %p1947_p6, %p1946_p2 }
  0x56   : > { %p1944_p10 = pneg %p1943_p4 }
  0x58   : > { %p1949_p7 = pnand %p1948_p12, %p1944_p10 }
  0x5a   : > { %1952 = shalt.err (!%p1949_p7)
}
  0x5b   : > { %s1953_s9 = scalar_lea.vmem %s268_s7, 64  ;;  %s2051_s13 = smov [#allocation6]  }
  0x5c   : > { %p1954_p9 = scmp.ne.s32.totalorder %s268_s7, %s1953_s9  ;;  %s1958_s15 = sshll.u32 %s2051_s13, 4  ;;  %s1959_s15 = int_to_ptr.vmem [resolvable:$false] %s1958_s15 }
  0x5d   : > { %s1960_s26 = scalar_lea.vmem %s1959_s15, 128  ;;  %p1961_p1 = scmp.lt.s32.totalorder %s268_s7, %s1959_s15 }
  0x5e   : > { %p1956_p13 = pnand %p1954_p9, %p1914_p0  ;;  %p1962_p3 = scmp.lt.s32.totalorder %s1960_s26, %s1953_s9 }
  0x60   : > { %p1957_p5 = pneg %p1956_p13  ;;  %p1963_p4 = por %p1962_p3, %p1961_p1 }
  0x62   : > { %p1964_p8 = pnand %p1963_p4, %p1957_p5 }
  0x64   : > { %1967 = shalt.err (!%p1964_p8)
}
  0x65   : > { %1745 = dma.hbm_to_vmem [thread:$0]  (!%p2222_p11), %s2229_s20, 64, %s268_s7, %s257_s12  }
  0x66   : > { %p2559_p10 = scmp.ne.s32.totalorder %s2551_s29, 0 }
  0x67   : > { %s2280_s11 = sand.u32 (!%p2559_p10), 1, %s2036_s22   ;;  %p2560_p0 = scmp.ne.s32.totalorder (!%p2559_p10), %s2549_s27, 0 }
  0x68   : > { %276 = sbr.rel (%p2559_p10) target bundleno = 1592 (0x638), region = 44  ;;  %s1535_s4 = sshll.u32 (!%p2559_p10), %s2280_s11, 2 }
  0x69   : > { %s279_s14 = scalar_lea.sflag (!%p2559_p10), [#allocation4], %s2280_s11  ;;  %s282_s17 = scalar_lea.vmem (!%p2559_p10), [#allocation3], %s1535_s4 }
  0x6d   : > { %2011 = dma.done.wait (%p2560_p0), %s279_s14, 64  }
  0x6e   : > { %2013 = vsyncadd (%p2560_p0), %s279_s14, 4294967232  ;;  %s287_s16 = sand.u32 1, %s2141_s25   ;;  %s2289_s29 = scalar_lea.vmem [#allocation6], %s1535_s4 }
  0x6f   : > { %s288_s20 = scalar_lea.sflag [#allocation7], %s287_s16 }
  0x70   : > { %2015 = dma.done.wait (%p2560_p0), %s288_s20, 64  }
  0x71   : > { %2017 = vsyncadd (%p2560_p0), %s288_s20, 4294967232  ;;  %p2561_p8 = scmp.eq.s32.totalorder %s2141_s25, 0 }
  0x73   : > { %2019 = dma.done.wait (%p2561_p8), [#allocation7], 256   ;;  %p2562_p11 = pmov %p2561_p8 }
  0x74   : > { %p2563_p2 = pmov %p2561_p8 }
  0x75   : > { %2021 = vsyncadd (%p2562_p11), [#allocation7], 4294967040 }
  0x76   : > { %2023 = dma.done.wait (%p2563_p2), [#allocation10], 256   ;;  %p2564_p6 = pmov %p2563_p2 }
  0x77   : > { %v2052_v0 = vmov 0.0   ;;  %vm2053_vm0 = vmmov 0   ;;  %v1824_v1 = vld [vmem:[#allocation8 + $0x8] sm:$0xff]   ;;  %v1825_v2 = vld [vmem:[#allocation8] sm:$0xff]   ;;  %v334_v3 = vld [vmem:[%s282_s17] sm:$0xf] }
  0x78   : > { %2025 = vsyncadd (%p2564_p6), [#allocation10], 4294967040  ;;  %1606 = vmatprep.subr.bf16.mxu0 %v2052_v0  ;;  %1610 = vmatprep.mubr.msk.bf16.mxu0 %vm2053_vm0, %v2052_v0  ;;  %vm358_vm1 = vcmask 261120   ;;  %v1540_v4 = vld [vmem:[%s2539_s3] ss:$0 sm:$0xff]  ;;  %s2054_s12 = smov 124  }
  0x79   : > { %1614 = vmatprep.subr.bf16.mxu1 %v2052_v0  ;;  %1616 = vmatprep.mubr.msk.bf16.mxu1 %vm2053_vm0, %v2052_v0  ;;  %s2055_s8 = smov 96   ;;  %s2056_s2 = smov 88   ;;  %vm408_vm2 = vcmask 31744   ;;  %v402_v34 = vld [vmem:[%s2289_s29] sm:$0xf]  ;;  %vm455_vm3 = vcmask 64512  }
  0x7a   : > { %1607 = vmatpush3.bf16.msra.mxu0 %v1824_v1  ;;  %s2057_s10 = smov 92   ;;  %s2058_s18 = smov 84   ;;  %v403_v35 = vunpack.c.l.bf16 %v402_v34  ;;  %vm473_vm4 = vcmask 1043456   ;;  %vm632_vm5 = vcmask 64544   ;;  %vm748_vm6 = vcmask 97344  }
  0x7b   : > { %1608 = vmatprep.subr.bf16.mxu0 %v2052_v0  ;;  %s2059_s9 = smov 120   ;;  %s2060_s13 = smov 80   ;;  %vm864_vm7 = vcmask 130144   ;;  %vm980_vm8 = vcmask 162944   ;;  %vm1096_vm9 = vcmask 195744   ;;  %vm1212_vm10 = vcmask 228544  }
  0x7c   : > { %s2061_s15 = smov 116   ;;  %s2062_s26 = smov 76   ;;  %vm1328_vm11 = vcmask 261344  }
  0x7d   : > { %s2063_s4 = smov 112   ;;  %s2064_s14 = smov 72  }
  0x7e   : > { %1609 = vmatpush3.bf16.msra.mxu0 %v1825_v2  ;;  %s2065_s17 = smov 108   ;;  %s2066_s16 = smov 68  }
  0x7f   : > { %1620 = vmatprep.subr.bf16.mxu0 %v2052_v0  ;;  %s2067_s20 = smov 104   ;;  %s2068_s27 = smov 100  }
  0x80   : > { %s2069_s29 = smov 60   ;;  %s2070_s7 = smov 64  }
  0x81   : > { %1611 = vmatmul.mubr.msk.bf16.vlgmr.msra.gmra.mxu0 %vm358_vm1, %v334_v3  ;;  %p2565_p7 = scmp.ne.s32.totalorder %s2556_s30, 0 }
  0x82   : > { %1622 = vmatprep.mubr.msk.bf16.mxu0 %vm2053_vm0, %v2052_v0 }
 0x141   : > { %v396_v5 = vpop.f32.mrf.mxu0 }
 0x142   : > { %v397_v6 = vadd.f32 %v1540_v4, %v396_v5 }
 0x143   : > { %v1612_v7 = vpop.f32.mrf.mxu0 }
 0x144   : > { %v2317_v8 = vpack.c.bf16 %v397_v6, %v397_v6 }
 0x145   : > { %v399_v9 = vpop.f32.mrf.mxu0 }
 0x146   : > { %518 = vrot.lane.b32.xlu1 %v2317_v8, %s2054_s12  ;;  %406 = vrot.lane.b32.xlu0 %v2317_v8, %s2055_s8  ;;  %s2071_s12 = smov 56   ;;  %s2072_s8 = smov 52  }
 0x147   : > { %v1613_v10 = vpop.f32.mrf.mxu0 }
 0x14a   : > { %636 = vrot.lane.b32.xlu1 %v2317_v8, %s2056_s2  ;;  %520 = vrot.lane.b32.xlu0 %v2317_v8, %s2057_s10  ;;  %s2073_s2 = smov 44   ;;  %s2074_s10 = smov 40  }
 0x14e   : > { %752 = vrot.lane.b32.xlu1 %v2317_v8, %s2058_s18  ;;  %634 = vrot.lane.b32.xlu0 %v2317_v8, %s2059_s9  ;;  %s2075_s18 = smov 36   ;;  %s2076_s9 = smov 48  }
 0x152   : > { %868 = vrot.lane.b32.xlu1 %v2317_v8, %s2060_s13  ;;  %750 = vrot.lane.b32.xlu0 %v2317_v8, %s2061_s15  ;;  %s2077_s13 = smov 4   ;;  %s2078_s15 = smov 8  }
 0x156   : > { %984 = vrot.lane.b32.xlu1 %v2317_v8, %s2062_s26  ;;  %866 = vrot.lane.b32.xlu0 %v2317_v8, %s2063_s4  ;;  %s2079_s26 = smov 12   ;;  %s2080_s4 = smov 16  }
 0x15a   : > { %1100 = vrot.lane.b32.xlu1 %v2317_v8, %s2064_s14  ;;  %982 = vrot.lane.b32.xlu0 %v2317_v8, %s2065_s17  ;;  %s2081_s14 = smov 20   ;;  %s2082_s17 = smov 24  }
 0x15e   : > { %1216 = vrot.lane.b32.xlu1 %v2317_v8, %s2066_s16  ;;  %1098 = vrot.lane.b32.xlu0 %v2317_v8, %s2067_s20  ;;  %s2083_s16 = smov 28   ;;  %s1539_s20 = sshll.u32 %s2280_s11, 3 }
 0x162   : > { %1214 = vrot.lane.b32.xlu0 %v2317_v8, %s2068_s27 }
 0x1b8   : > { %v407_v11 = vpop.permute.xlu0 %406  ;;  %v519_v14 = vpop.permute.xlu1 %518 }
 0x1b9   : > { %v413_v12 = vsel %vm408_vm2, %v407_v11, 0 }
 0x1ba   : > { %1615 = vmatpush3.bf16.xpose.msra.mxu1 %v413_v12 }
 0x1bb   : > { %1626 = vmatprep.subr.bf16.mxu1 %v2052_v0 }
 0x1bc   : > { %v521_v13 = vpop.permute.xlu0 %520  ;;  %v637_v16 = vpop.permute.xlu1 %636 }
 0x1bd   : > { %v526_v15 = vsel %vm408_vm2, %v521_v13, 0  ;;  %v642_v17 = vsel %vm408_vm2, %v637_v16, 0 }
 0x1c0   : > { %v753_v18 = vpop.permute.xlu1 %752  ;;  %v635_v19 = vpop.permute.xlu0 %634 }
 0x1c1   : > { %1617 = vmatmul.mubr.msk.bf16.vlgmr.msra.gmra.mxu1 %vm408_vm2, %v2317_v8  ;;  %v758_v20 = vsel %vm408_vm2, %v753_v18, 0 }
 0x1c2   : > { %1627 = vmatpush3.bf16.xpose.msra.mxu1 %v526_v15  ;;  %1628 = vmatprep.mubr.msk.bf16.mxu1 %vm2053_vm0, %v2052_v0 }
 0x1c3   : > { %1638 = vmatprep.subr.bf16.mxu1 %v2052_v0 }
 0x1c4   : > { %v869_v21 = vpop.permute.xlu1 %868  ;;  %v751_v22 = vpop.permute.xlu0 %750 }
 0x1c5   : > { %v874_v23 = vsel %vm408_vm2, %v869_v21, 0 }
 0x1c8   : > { %v985_v24 = vpop.permute.xlu1 %984  ;;  %v867_v25 = vpop.permute.xlu0 %866 }
 0x1c9   : > { %1629 = vmatmul.mubr.msk.bf16.vlgmr.msra.gmra.mxu1 %vm408_vm2, %v519_v14  ;;  %v990_v26 = vsel %vm408_vm2, %v985_v24, 0 }
 0x1ca   : > { %1639 = vmatpush3.bf16.xpose.msra.mxu1 %v642_v17  ;;  %1640 = vmatprep.mubr.msk.bf16.mxu1 %vm2053_vm0, %v2052_v0 }
 0x1cb   : > { %1650 = vmatprep.subr.bf16.mxu1 %v2052_v0 }
 0x1cc   : > { %v1101_v27 = vpop.permute.xlu1 %1100  ;;  %v983_v28 = vpop.permute.xlu0 %982 }
 0x1cd   : > { %v1106_v29 = vsel %vm408_vm2, %v1101_v27, 0 }
 0x1d0   : > { %v1217_v30 = vpop.permute.xlu1 %1216  ;;  %v1099_v31 = vpop.permute.xlu0 %1098 }
 0x1d1   : > { %1641 = vmatmul.mubr.msk.bf16.vlgmr.msra.gmra.mxu1 %vm408_vm2, %v635_v19  ;;  %v1222_v32 = vsel %vm408_vm2, %v1217_v30, 0 }
 0x1d2   : > { %1651 = vmatpush3.bf16.xpose.msra.mxu1 %v758_v20  ;;  %1652 = vmatprep.mubr.msk.bf16.mxu1 %vm2053_vm0, %v2052_v0 }
 0x1d3   : > { %1662 = vmatprep.subr.bf16.mxu1 %v2052_v0 }
 0x1d4   : > { %v1215_v33 = vpop.permute.xlu0 %1214 }
 0x1d9   : > { %1653 = vmatmul.mubr.msk.bf16.vlgmr.msra.gmra.mxu1 %vm408_vm2, %v751_v22 }
 0x1da   : > { %1663 = vmatpush3.bf16.xpose.msra.mxu1 %v874_v23  ;;  %1664 = vmatprep.mubr.msk.bf16.mxu1 %vm2053_vm0, %v2052_v0 }
 0x1db   : > { %1674 = vmatprep.subr.bf16.mxu1 %v2052_v0 }
 0x1e1   : > { %1665 = vmatmul.mubr.msk.bf16.vlgmr.msra.gmra.mxu1 %vm408_vm2, %v867_v25 }
 0x1e2   : > { %1675 = vmatpush3.bf16.xpose.msra.mxu1 %v990_v26  ;;  %1676 = vmatprep.mubr.msk.bf16.mxu1 %vm2053_vm0, %v2052_v0 }
 0x1e3   : > { %1686 = vmatprep.subr.bf16.mxu1 %v2052_v0 }
 0x1e9   : > { %1677 = vmatmul.mubr.msk.bf16.vlgmr.msra.gmra.mxu1 %vm408_vm2, %v983_v28 }
 0x1ea   : > { %1687 = vmatpush3.bf16.xpose.msra.mxu1 %v1106_v29  ;;  %1688 = vmatprep.mubr.msk.bf16.mxu1 %vm2053_vm0, %v2052_v0 }
 0x1eb   : > { %1698 = vmatprep.subr.bf16.mxu1 %v2052_v0 }
 0x1f1   : > { %1689 = vmatmul.mubr.msk.bf16.vlgmr.msra.gmra.mxu1 %vm408_vm2, %v1099_v31 }
 0x1f2   : > { %1699 = vmatpush3.bf16.xpose.msra.mxu1 %v1222_v32  ;;  %1700 = vmatprep.mubr.msk.bf16.mxu1 %vm2053_vm0, %v2052_v0 }
 0x1f3   : > { %1710 = vmatprep.subr.bf16.mxu1 %v2052_v0 }
 0x1f9   : > { %1701 = vmatmul.mubr.msk.bf16.vlgmr.msra.gmra.mxu1 %vm408_vm2, %v1215_v33 }
 0x1fa   : > { %1714 = vmatprep.mubr.msk.bf16.mxu1 %vm2053_vm0, %v2052_v0 }
 0x281   : > { %v449_v36 = vpop.f32.mrf.mxu1 }
 0x282   : > { %v2376_v37 = vadd.f32 %v449_v36, %v403_v35 }
 0x283   : > { %v1618_v38 = vpop.f32.mrf.mxu1 }
 0x284   : > { %v456_v39 = vsel %vm455_vm3, %v2376_v37, -inf }
 0x285   : > { %457 = vmax.xlane.f32.xlu1 %v456_v39  ;;  %v452_v40 = vpop.f32.mrf.mxu1 }
 0x287   : > { %v1619_v41 = vpop.f32.mrf.mxu1 }
 0x289   : > { %v562_v42 = vpop.f32.mrf.mxu1 }
 0x28a   : > { %v563_v43 = vadd.f32 %v562_v42, %v403_v35 }
 0x28b   : > { %v1630_v44 = vpop.f32.mrf.mxu1 }
 0x28c   : > { %v568_v45 = vsel %vm455_vm3, %v563_v43, -inf }
 0x28d   : > { %569 = vmax.xlane.f32.xlu0 %v568_v45  ;;  %v565_v46 = vpop.f32.mrf.mxu1 }
 0x28f   : > { %v1631_v47 = vpop.f32.mrf.mxu1 }
 0x291   : > { %v678_v48 = vpop.f32.mrf.mxu1 }
 0x292   : > { %v679_v49 = vadd.f32 %v678_v48, %v403_v35 }
 0x293   : > { %v1642_v50 = vpop.f32.mrf.mxu1 }
 0x294   : > { %v684_v51 = vsel %vm455_vm3, %v679_v49, -inf }
 0x295   : > { %685 = vmax.xlane.f32.xlu0 %v684_v51  ;;  %v681_v52 = vpop.f32.mrf.mxu1 }
 0x297   : > { %v1643_v53 = vpop.f32.mrf.mxu1 }
 0x299   : > { %v794_v54 = vpop.f32.mrf.mxu1 }
 0x29a   : > { %v795_v55 = vadd.f32 %v794_v54, %v403_v35 }
 0x29b   : > { %v1654_v56 = vpop.f32.mrf.mxu1 }
 0x29c   : > { %v800_v57 = vsel %vm455_vm3, %v795_v55, -inf }
 0x29d   : > { %801 = vmax.xlane.f32.xlu1 %v800_v57  ;;  %v797_v58 = vpop.f32.mrf.mxu1 }
 0x29f   : > { %v1655_v59 = vpop.f32.mrf.mxu1 }
 0x2a1   : > { %v910_v60 = vpop.f32.mrf.mxu1 }
 0x2a2   : > { %v911_v61 = vadd.f32 %v910_v60, %v403_v35 }
 0x2a3   : > { %v1666_v62 = vpop.f32.mrf.mxu1 }
 0x2a4   : > { %v916_v63 = vsel %vm455_vm3, %v911_v61, -inf }
 0x2a5   : > { %917 = vmax.xlane.f32.xlu0 %v916_v63  ;;  %v913_v1 = vpop.f32.mrf.mxu1 }
 0x2a7   : > { %v1667_v2 = vpop.f32.mrf.mxu1 }
 0x2a9   : > { %v1026_v3 = vpop.f32.mrf.mxu1 }
 0x2aa   : > { %v2384_v4 = vadd.f32 %v1026_v3, %v403_v35 }
 0x2ab   : > { %v1678_v5 = vpop.f32.mrf.mxu1 }
 0x2ac   : > { %v1032_v6 = vsel %vm455_vm3, %v2384_v4, -inf }
 0x2ad   : > { %1033 = vmax.xlane.f32.xlu1 %v1032_v6  ;;  %v1029_v7 = vpop.f32.mrf.mxu1 }
 0x2af   : > { %v1679_v9 = vpop.f32.mrf.mxu1 }
 0x2b1   : > { %v1142_v10 = vpop.f32.mrf.mxu1 }
 0x2b2   : > { %v1143_v11 = vadd.f32 %v1142_v10, %v403_v35 }
 0x2b3   : > { %v1690_v12 = vpop.f32.mrf.mxu1 }
 0x2b4   : > { %v1148_v13 = vsel %vm455_vm3, %v1143_v11, -inf }
 0x2b5   : > { %1149 = vmax.xlane.f32.xlu0 %v1148_v13  ;;  %v1145_v14 = vpop.f32.mrf.mxu1 }
 0x2b7   : > { %v1691_v15 = vpop.f32.mrf.mxu1 }
 0x2b9   : > { %v1258_v16 = vpop.f32.mrf.mxu1 }
 0x2ba   : > { %v2391_v20 = vadd.f32 %v1258_v16, %v403_v35 }
 0x2bb   : > { %v1702_v17 = vpop.f32.mrf.mxu1 }
 0x2bc   : > { %v1264_v21 = vsel %vm455_vm3, %v2391_v20, -inf }
 0x2bd   : > { %v1261_v18 = vpop.f32.mrf.mxu1 }
 0x2be   : > { %580 = vrot.lane.b32.xlu1 %v2317_v8, %s2069_s29 }
 0x2bf   : > { %v1703_v19 = vpop.f32.mrf.mxu1 }
 0x2cb   : > { %468 = vrot.lane.b32.xlu0 %v2317_v8, %s2070_s7  ;;  %s1565_s7 = sshll.u32 %s2141_s25, 7 }
 0x2e2   : > { %1265 = vmax.xlane.f32.xlu1 %v1264_v21 }
 0x2f3   : > { %696 = vrot.lane.b32.xlu1 %v2317_v8, %s2071_s12  ;;  %s332_s12 = scalar_lea.vmem [#allocation11], %s1539_s20 }
 0x30e   : > { %v458_v22 = vpop.xlane.xlu1 %457 }
 0x30f   : > { %v459_v23 = vsub.f32 %v2376_v37, %v458_v22 }
 0x311   : > { %v460_v24 = vmul.f32 1.442695, %v459_v23 }
 0x313   : > { %1828 = vpow2.f32 %v460_v24 }
 0x316   : > { %v570_v25 = vpop.xlane.xlu0 %569 }
 0x317   : > { %v571_v26 = vsub.f32 %v563_v43, %v570_v25 }
 0x319   : > { %v572_v27 = vmul.f32 1.442695, %v571_v26 }
 0x31b   : > { %1830 = vpow2.f32 %v572_v27 }
 0x31e   : > { %v686_v28 = vpop.xlane.xlu0 %685 }
 0x31f   : > { %v687_v29 = vsub.f32 %v679_v49, %v686_v28 }
 0x320   : > { %v2397_v30 = vpop.eup %1828 }
 0x321   : > { %v688_v31 = vmul.f32 1.442695, %v687_v29  ;;  %v462_v32 = vsel %vm455_vm3, %v2397_v30, 0.0 }
 0x322   : > { %463 = vadd.xlane.f32.xlu0 %v462_v32 }
 0x323   : > { %1832 = vpow2.f32 %v688_v31 }
 0x326   : > { %v802_v33 = vpop.xlane.xlu1 %801 }
 0x327   : > { %v803_v34 = vsub.f32 %v795_v55, %v802_v33 }
 0x328   : > { %v2401_v35 = vpop.eup %1830 }
 0x329   : > { %v804_v36 = vmul.f32 1.442695, %v803_v34  ;;  %v574_v37 = vsel %vm455_vm3, %v2401_v35, 0.0 }
 0x32a   : > { %575 = vadd.xlane.f32.xlu1 %v574_v37 }
 0x32b   : > { %1834 = vpow2.f32 %v804_v36 }
 0x32e   : > { %v918_v38 = vpop.xlane.xlu0 %917 }
 0x32f   : > { %v919_v39 = vsub.f32 %v911_v61, %v918_v38 }
 0x330   : > { %v2405_v40 = vpop.eup %1832 }
 0x331   : > { %v920_v41 = vmul.f32 1.442695, %v919_v39  ;;  %v690_v42 = vsel %vm455_vm3, %v2405_v40, 0.0 }
 0x332   : > { %691 = vadd.xlane.f32.xlu0 %v690_v42 }
 0x333   : > { %1836 = vpow2.f32 %v920_v41 }
 0x336   : > { %v1034_v52 = vpop.xlane.xlu1 %1033 }
 0x337   : > { %v1035_v53 = vsub.f32 %v2384_v4, %v1034_v52 }
 0x338   : > { %v2409_v43 = vpop.eup %1834 }
 0x339   : > { %v806_v44 = vsel %vm455_vm3, %v2409_v43, 0.0  ;;  %v1036_v56 = vmul.f32 1.442695, %v1035_v53 }
 0x33a   : > { %807 = vadd.xlane.f32.xlu1 %v806_v44  ;;  %v581_v59 = vpop.permute.xlu1 %580 }
 0x33b   : > { %v586_v10 = vsel %vm473_vm4, %v581_v59, 0 }
 0x33e   : > { %v1150_v45 = vpop.xlane.xlu0 %1149 }
 0x33f   : > { %v1151_v46 = vsub.f32 %v1143_v11, %v1150_v45 }
 0x340   : > { %v2413_v47 = vpop.eup %1836 }
 0x341   : > { %v1152_v48 = vmul.f32 1.442695, %v1151_v46  ;;  %v922_v49 = vsel %vm455_vm3, %v2413_v47, 0.0 }
 0x342   : > { %923 = vadd.xlane.f32.xlu1 %v922_v49  ;;  %v469_v50 = vpop.permute.xlu0 %468 }
 0x343   : > { %1838 = vpow2.f32 %v1152_v48  ;;  %v475_v51 = vsel %vm473_vm4, %v469_v50, 0 }
 0x344   : > { %1621 = vmatpush3.bf16.msra.mxu0 %v475_v51  ;;  %1840 = vpow2.f32 %v1036_v56 }
 0x345   : > { %1632 = vmatprep.subr.bf16.mxu0 %v2052_v0 }
 0x348   : > { %812 = vrot.lane.b32.xlu0 %v2317_v8, %s2072_s8  ;;  %s1413_s8 = sshll.u32 %s332_s12, 4  ;;  %s2494_s8 = int_to_ptr.vmem [resolvable:$true] %s1413_s8 }
 0x349   : > { %s1968_s25 = scalar_lea.vmem %s2494_s8, 128 }
 0x34a   : > { %p1969_p12 = scmp.ne.s32.totalorder %s2494_s8, %s1968_s25 }
 0x34c   : > { %p1970_p9 = pnand %p1969_p12, %p2565_p7 }
 0x34e   : > { %p1971_p13 = pneg %p1970_p9 }
 0x350   : > { %v2421_v54 = vpop.eup %1838 }
 0x351   : > { %v1154_v55 = vsel %vm455_vm3, %v2421_v54, 0.0  ;;  %v2425_v57 = vpop.eup %1840 }
 0x352   : > { %1155 = vadd.xlane.f32.xlu1 %v1154_v55  ;;  %v1038_v58 = vsel %vm455_vm3, %v2425_v57, 0.0 }
 0x367   : > { %1039 = vadd.xlane.f32.xlu0 %v1038_v58 }
 0x36b   : > { %v1266_v60 = vpop.xlane.xlu1 %1265 }
 0x36c   : > { %v1267_v61 = vsub.f32 %v2391_v20, %v1266_v60 }
 0x36e   : > { %v1268_v62 = vmul.f32 1.442695, %v1267_v61 }
 0x36f   : > { %v697_v3 = vpop.permute.xlu1 %696 }
 0x370   : > { %1842 = vpow2.f32 %v1268_v62  ;;  %v702_v14 = vsel %vm473_vm4, %v697_v3, 0 }
 0x37d   : > { %v2430_v63 = vpop.eup %1842  ;;  %1044 = vrot.lane.b32.xlu0 %v2317_v8, %s2073_s2 }
 0x37e   : > { %v1270_v1 = vsel %vm455_vm3, %v2430_v63, 0.0 }
 0x37f   : > { %1271 = vadd.xlane.f32.xlu1 %v1270_v1 }
 0x381   : > { %1160 = vrot.lane.b32.xlu0 %v2317_v8, %s2074_s10 }
 0x385   : > { %1276 = vrot.lane.b32.xlu0 %v2317_v8, %s2075_s18  ;;  %s2492_s18 = scalar_lea.hbm %s2542_s6, %s1565_s7 }
 0x390   : > { %928 = vrot.lane.b32.xlu1 %v2317_v8, %s2076_s9  ;;  %s1400_s9 = scalar_lea.sflag [#allocation5], %s2280_s11 }
 0x3ab   : > { %v464_v2 = vpop.xlane.xlu0 %463 }
 0x3ac   : > { %1844 = vrcp.f32 %v464_v2 }
 0x3b3   : > { %v576_v4 = vpop.xlane.xlu1 %575 }
 0x3b4   : > { %1846 = vrcp.f32 %v576_v4 }
 0x3b9   : > { %v1845_v5 = vpop.eup %1844 }
 0x3ba   : > { %v466_v6 = vmul.f32 %v1845_v5, %v2397_v30 }
 0x3bb   : > { %v692_v7 = vpop.xlane.xlu0 %691 }
 0x3bc   : > { %1848 = vrcp.f32 %v692_v7  ;;  %v467_v9 = vpack.c.bf16 %v466_v6, %v466_v6  ;;  %v1826_v7 = vld [vmem:[#allocation9 + $0x8] sm:$0xff]  }
 0x3bd   : > { %1711 = vmatpush3.bf16.msra.mxu1 %v1826_v7 }
 0x3be   : > { %1623 = vmatmul.mubr.msk.bf16.vlgmr.msra.gmra.mxu0 %vm455_vm3, %v467_v9  ;;  %1712 = vmatprep.subr.bf16.mxu1 %v2052_v0 }
 0x3bf   : > { %1633 = vmatpush3.bf16.msra.mxu0 %v586_v10  ;;  %1634 = vmatprep.mubr.msk.bf16.mxu0 %vm2053_vm0, %v2052_v0  ;;  %v813_v17 = vpop.permute.xlu0 %812  ;;  %v1827_v10 = vld [vmem:[#allocation9] sm:$0xff]  }
 0x3c0   : > { %1644 = vmatprep.subr.bf16.mxu0 %v2052_v0  ;;  %v818_v19 = vsel %vm473_vm4, %v813_v17, 0 }
 0x3c1   : > { %v1847_v8 = vpop.eup %1846  ;;  %1713 = vmatpush3.bf16.msra.mxu1 %v1827_v10 }
 0x3c2   : > { %v578_v11 = vmul.f32 %v1847_v8, %v2401_v35 }
 0x3c3   : > { %v808_v12 = vpop.xlane.xlu1 %807 }
 0x3c4   : > { %1850 = vrcp.f32 %v808_v12  ;;  %v579_v13 = vpack.c.bf16 %v578_v11, %v578_v11 }
 0x3c6   : > { %1635 = vmatmul.mubr.msk.bf16.vlgmr.msra.gmra.mxu0 %vm455_vm3, %v579_v13 }
 0x3c7   : > { %1645 = vmatpush3.bf16.msra.mxu0 %v702_v14  ;;  %1646 = vmatprep.mubr.msk.bf16.mxu0 %vm2053_vm0, %v2052_v0 }
 0x3c8   : > { %1656 = vmatprep.subr.bf16.mxu0 %v2052_v0 }
 0x3c9   : > { %v1849_v15 = vpop.eup %1848 }
 0x3ca   : > { %v694_v16 = vmul.f32 %v1849_v15, %v2405_v40 }
 0x3cb   : > { %v924_v23 = vpop.xlane.xlu1 %923 }
 0x3cc   : > { %v695_v18 = vpack.c.bf16 %v694_v16, %v694_v16  ;;  %1852 = vrcp.f32 %v924_v23 }
 0x3ce   : > { %1647 = vmatmul.mubr.msk.bf16.vlgmr.msra.gmra.mxu0 %vm455_vm3, %v695_v18 }
 0x3cf   : > { %1657 = vmatpush3.bf16.msra.mxu0 %v818_v19  ;;  %1658 = vmatprep.mubr.msk.bf16.mxu0 %vm2053_vm0, %v2052_v0 }
 0x3d0   : > { %1668 = vmatprep.subr.bf16.mxu0 %v2052_v0 }
 0x3d1   : > { %v1851_v20 = vpop.eup %1850 }
 0x3d2   : > { %v810_v21 = vmul.f32 %v1851_v20, %v2409_v43 }
 0x3d4   : > { %v811_v22 = vpack.c.bf16 %v810_v21, %v810_v21 }
 0x3d6   : > { %1659 = vmatmul.mubr.msk.bf16.vlgmr.msra.gmra.mxu0 %vm455_vm3, %v811_v22 }
 0x3d7   : > { %1670 = vmatprep.mubr.msk.bf16.mxu0 %vm2053_vm0, %v2052_v0 }
 0x3d9   : > { %v1853_v26 = vpop.eup %1852 }
 0x3da   : > { %v926_v28 = vmul.f32 %v1853_v26, %v2413_v47  ;;  %v1560_v26 = vld [vmem:[%s2541_s5] ss:$0 sm:$0xff] }
 0x3db   : > { %v1156_v25 = vpop.xlane.xlu1 %1155 }
 0x3dc   : > { %v927_v32 = vpack.c.bf16 %v926_v28, %v926_v28 }
 0x3f0   : > { %v1040_v24 = vpop.xlane.xlu0 %1039 }
 0x3f1   : > { %1854 = vrcp.f32 %v1040_v24 }
 0x3f2   : > { %1856 = vrcp.f32 %v1156_v25 }
 0x3f4   : > { %v1045_v31 = vpop.permute.xlu0 %1044 }
 0x3f5   : > { %v1050_v34 = vsel %vm473_vm4, %v1045_v31, 0 }
 0x3f8   : > { %v1161_v36 = vpop.permute.xlu0 %1160 }
 0x3f9   : > { %v1166_v39 = vsel %vm473_vm4, %v1161_v36, 0 }
 0x3fc   : > { %v1277_v41 = vpop.permute.xlu0 %1276 }
 0x3fd   : > { %v1282_v44 = vsel %vm473_vm4, %v1277_v41, 0 }
 0x3fe   : > { %v1855_v33 = vpop.eup %1854 }
 0x3ff   : > { %v1042_v35 = vmul.f32 %v1855_v33, %v2425_v57  ;;  %v1857_v38 = vpop.eup %1856 }
 0x400   : > { %v1158_v40 = vmul.f32 %v1857_v38, %v2421_v54 }
 0x401   : > { %v1043_v37 = vpack.c.bf16 %v1042_v35, %v1042_v35 }
 0x402   : > { %v1159_v42 = vpack.c.bf16 %v1158_v40, %v1158_v40 }
 0x408   : > { %v1272_v27 = vpop.xlane.xlu1 %1271 }
 0x409   : > { %1858 = vrcp.f32 %v1272_v27 }
 0x40c   : > { %v929_v29 = vpop.permute.xlu1 %928 }
 0x40d   : > { %v934_v30 = vsel %vm473_vm4, %v929_v29, 0 }
 0x40e   : > { %1669 = vmatpush3.bf16.msra.mxu0 %v934_v30 }
 0x40f   : > { %1680 = vmatprep.subr.bf16.mxu0 %v2052_v0 }
 0x411   : > { %1671 = vmatmul.mubr.msk.bf16.vlgmr.msra.gmra.mxu0 %vm455_vm3, %v927_v32 }
 0x412   : > { %1681 = vmatpush3.bf16.msra.mxu0 %v1050_v34  ;;  %1682 = vmatprep.mubr.msk.bf16.mxu0 %vm2053_vm0, %v2052_v0 }
 0x413   : > { %1692 = vmatprep.subr.bf16.mxu0 %v2052_v0 }
 0x416   : > { %v1859_v43 = vpop.eup %1858 }
 0x417   : > { %v1274_v45 = vmul.f32 %v1859_v43, %v2430_v63 }
 0x419   : > { %1683 = vmatmul.mubr.msk.bf16.vlgmr.msra.gmra.mxu0 %vm455_vm3, %v1043_v37  ;;  %v1275_v46 = vpack.c.bf16 %v1274_v45, %v1274_v45 }
 0x41a   : > { %1693 = vmatpush3.bf16.msra.mxu0 %v1166_v39  ;;  %1694 = vmatprep.mubr.msk.bf16.mxu0 %vm2053_vm0, %v2052_v0 }
 0x41b   : > { %1704 = vmatprep.subr.bf16.mxu0 %v2052_v0 }
 0x421   : > { %1695 = vmatmul.mubr.msk.bf16.vlgmr.msra.gmra.mxu0 %vm455_vm3, %v1159_v42 }
 0x422   : > { %1705 = vmatpush3.bf16.msra.mxu0 %v1282_v44  ;;  %1706 = vmatprep.mubr.msk.bf16.mxu0 %vm2053_vm0, %v2052_v0 }
 0x429   : > { %1707 = vmatmul.mubr.msk.bf16.vlgmr.msra.gmra.mxu0 %vm455_vm3, %v1275_v46 }
 0x47e   : > { %v511_v47 = vpop.f32.mrf.mxu0 }
 0x47f   : > { %517 = vst.msk [vmem:[#allocation2] sm:$0xff] %vm408_vm2, %v511_v47 }
 0x480   : > { %v1624_v48 = vpop.f32.mrf.mxu0 }
 0x482   : > { %v514_v49 = vpop.f32.mrf.mxu0 }
 0x484   : > { %v1625_v50 = vpop.f32.mrf.mxu0 }
 0x486   : > { %v622_v51 = vpop.f32.mrf.mxu0 }
 0x487   : > { %629 = vrot.lane.b32.xlu1 %v622_v51, %s2077_s13  ;;  %s2084_s13 = smov [#allocation11]  }
 0x488   : > { %v1636_v52 = vpop.f32.mrf.mxu0 }
 0x48a   : > { %v625_v53 = vpop.f32.mrf.mxu0 }
 0x48c   : > { %v1637_v54 = vpop.f32.mrf.mxu0 }
 0x48e   : > { %v738_v55 = vpop.f32.mrf.mxu0 }
 0x48f   : > { %745 = vrot.lane.b32.xlu0 %v738_v55, %s2078_s15  ;;  %s1972_s15 = sshll.u32 %s2084_s13, 4  ;;  %s1973_s15 = int_to_ptr.vmem [resolvable:$false] %s1972_s15 }
 0x490   : > { %v1648_v56 = vpop.f32.mrf.mxu0  ;;  %p1975_p5 = scmp.lt.s32.totalorder %s2494_s8, %s1973_s15 }
 0x492   : > { %v741_v57 = vpop.f32.mrf.mxu0 }
 0x494   : > { %v1649_v58 = vpop.f32.mrf.mxu0 }
 0x496   : > { %v854_v59 = vpop.f32.mrf.mxu0 }
 0x497   : > { %861 = vrot.lane.b32.xlu1 %v854_v59, %s2079_s26  ;;  %s1974_s26 = scalar_lea.vmem %s1973_s15, 256 }
 0x498   : > { %v1660_v60 = vpop.f32.mrf.mxu0  ;;  %p1976_p1 = scmp.lt.s32.totalorder %s1974_s26, %s1968_s25 }
 0x49a   : > { %v857_v61 = vpop.f32.mrf.mxu0  ;;  %p1977_p3 = por %p1976_p1, %p1975_p5 }
 0x49c   : > { %v1661_v62 = vpop.f32.mrf.mxu0  ;;  %p1978_p4 = pnand %p1977_p3, %p1971_p13 }
 0x4d1   : > { %v970_v63 = vpop.f32.mrf.mxu0 }
 0x4d2   : > { %977 = vrot.lane.b32.xlu0 %v970_v63, %s2080_s4 }
 0x4d3   : > { %v1672_v1 = vpop.f32.mrf.mxu0 }
 0x4d5   : > { %v973_v2 = vpop.f32.mrf.mxu0 }
 0x4d7   : > { %v1673_v3 = vpop.f32.mrf.mxu0 }
 0x4d9   : > { %v1086_v4 = vpop.f32.mrf.mxu0 }
 0x4da   : > { %1093 = vrot.lane.b32.xlu1 %v1086_v4, %s2081_s14 }
 0x4db   : > { %v1684_v5 = vpop.f32.mrf.mxu0 }
 0x4dd   : > { %v1089_v6 = vpop.f32.mrf.mxu0 }
 0x4df   : > { %v1685_v9 = vpop.f32.mrf.mxu0 }
 0x4e1   : > { %v1202_v8 = vpop.f32.mrf.mxu0 }
 0x4e2   : > { %1209 = vrot.lane.b32.xlu0 %v1202_v8, %s2082_s17 }
 0x4e3   : > { %v1696_v11 = vpop.f32.mrf.mxu0 }
 0x4e5   : > { %v1205_v12 = vpop.f32.mrf.mxu0 }
 0x4e7   : > { %v1697_v13 = vpop.f32.mrf.mxu0 }
 0x4e9   : > { %v1318_v14 = vpop.f32.mrf.mxu0 }
 0x4ea   : > { %1325 = vrot.lane.b32.xlu1 %v1318_v14, %s2083_s16 }
 0x4eb   : > { %v1708_v15 = vpop.f32.mrf.mxu0 }
 0x4ed   : > { %v1321_v16 = vpop.f32.mrf.mxu0 }
 0x4ef   : > { %v1709_v17 = vpop.f32.mrf.mxu0 }
 0x4f9   : > { %v630_v18 = vpop.permute.xlu1 %629 }
 0x4fa   : > { %633 = vst.msk [vmem:[#allocation2] sm:$0xff] %vm632_vm5, %v630_v18 }
 0x501   : > { %v746_v19 = vpop.permute.xlu0 %745 }
 0x502   : > { %749 = vst.msk [vmem:[#allocation2] sm:$0xff] %vm748_vm6, %v746_v19 }
 0x509   : > { %v862_v0 = vpop.permute.xlu1 %861 }
 0x50a   : > { %865 = vst.msk [vmem:[#allocation2] sm:$0xff] %vm864_vm7, %v862_v0 }
 0x544   : > { %v978_v20 = vpop.permute.xlu0 %977 }
 0x545   : > { %981 = vst.msk [vmem:[#allocation2] sm:$0xff] %vm980_vm8, %v978_v20 }
 0x54c   : > { %v1094_v21 = vpop.permute.xlu1 %1093 }
 0x54d   : > { %1097 = vst.msk [vmem:[#allocation2] sm:$0xff] %vm1096_vm9, %v1094_v21 }
 0x554   : > { %v1210_v22 = vpop.permute.xlu0 %1209 }
 0x555   : > { %1213 = vst.msk [vmem:[#allocation2] sm:$0xff] %vm1212_vm10, %v1210_v22 }
 0x55c   : > { %v1326_v23 = vpop.permute.xlu1 %1325 }
 0x55d   : > { %1329 = vst.msk [vmem:[#allocation2] sm:$0xff] %vm1328_vm11, %v1326_v23 }
 0x564   : > { %v1330_v24 = vld [vmem:[#allocation2] sm:$0xff] }
 0x565   : > { %v1331_v25 = vpack.c.bf16 %v1330_v24, %v1330_v24 }
 0x567   : > { %1715 = vmatmul.mubr.msk.bf16.vlgmr.msra.gmra.mxu1 %vm358_vm1, %v1331_v25 }
 0x627   : > { %v1392_v27 = vpop.f32.mrf.mxu1 }
 0x628   : > { %v1393_v28 = vadd.f32 %v1560_v26, %v1392_v27 }
 0x629   : > { %v1716_v29 = vpop.f32.mrf.mxu1 }
 0x62a   : > { %1398 = vst.msk [vmem:[%s332_s12] sm:$0xff] %vm358_vm1, %v1393_v28 }
 0x62b   : > { %v1395_v30 = vpop.f32.mrf.mxu1 }
 0x62c   : > { %1981 = shalt.err (!%p1978_p4)
}
 0x62d   : > { %s1982_s4 = scalar_lea.hbm %s2492_s18, 128  ;;  %s1986_s17 = scalar_lea.hbm %s2542_s6, 256 }
 0x62e   : > { %p1983_p10 = scmp.ne.s32.totalorder %s2492_s18, %s1982_s4  ;;  %p1987_p11 = scmp.lt.s32.totalorder %s2492_s18, %s2542_s6 }
 0x62f   : > { %p1988_p2 = scmp.lt.s32.totalorder %s1986_s17, %s1982_s4 }
 0x630   : > { %p1984_p0 = pnand %p1983_p10, %p2565_p7 }
 0x631   : > { %p1989_p6 = por %p1988_p2, %p1987_p11 }
 0x632   : > { %p1985_p8 = pneg %p1984_p0 }
 0x634   : > { %p1990_p12 = pnand %p1989_p6, %p1985_p8 }
 0x636   : > { %1993 = shalt.err (!%p1990_p12)
}
 0x637   : > { %1730 = dma.vmem_to_hbm [thread:$0]  (%p2565_p7), %s2494_s8, 128, %s2492_s18, %s1400_s9   ;;  %v1717_v31 = vpop.f32.mrf.mxu1 }
 0x638 PF: > { %s1425_s27 = sand.u32 1, %s2032_s21   ;;  %p2566_p9 = scmp.ne.s32.totalorder %s2550_s28, 0 }
 0x639   : > { %p2567_p13 = scmp.ge.s32.totalorder %s2044_s24, 2  ;;  %s1426_s29 = scalar_lea.sflag [#allocation5], %s1425_s27 }
 0x63b   : > { %p1747_p5 = pnand %p2567_p13, %p2566_p9 }
 0x63d   : > { %p1748_p1 = pneg %p1747_p5 }
 0x63f   : > { %2027 = dma.done.wait (%p1748_p1), %s1426_s29, 128  }
 0x640   : > { %2029 = vsyncadd (%p1748_p1), %s1426_s29, 4294967168  ;;  %s2568_s30 = sld [smem:[#allocation17_spill]]  ;;  %p23_p3 = scmp.ge.s32.totalorder %s2192_s19, 4  }
 0x641   : > { %s2569_s21 = smov %s2036_s22  ;;  %s2570_s22 = smov %s2040_s23 }
 0x642   : > { %s2572_s24 = smov %s2192_s19  ;;  %25 = sbr.rel (!%p23_p3) target bundleno = 11 (0xb), region = 110 }
 0x646   : > { %s2571_s23 = smov %s2568_s30 }
 0x647   :  { %1431 = vsyncpa [#allocation4], 1 }
 0x648   :  { %1433 = vsyncpa [#allocation4 + $0x1], 1 }
 0x649   :  { %1434 = vsyncpa [#allocation7], 1 }
 0x64a   :  { %1436 = vsyncpa [#allocation7 + $0x1], 1 }
 0x64b   :  { %1437 = vsyncpa [#allocation10], 1 }
 0x64c   :  { %1438 = vsyncpa [#allocation5], 1 }
 0x64d   :  { %1440 = vsyncpa [#allocation5 + $0x1], 1 }

</bundles_post_ra>
